<compile_context>
chip_gen: v5e
topology: v5e:2x2
jax: 0.10.0
libtpu: 0.0.40
codegen_flags: <defaults>
</compile_context>

<pallas_src>
import functools

import jax
import jax.numpy as jnp
from jax.experimental import pallas as pl
from jax.experimental.pallas import tpu as pltpu


def _round_up(x, m):
    return ((x + m - 1) // m) * m


# ----------------------------------------------------------------------------
# Kernel 1: tiled linear  out = [relu](x @ Wt + bias)
#   Used for every identity-adjacency GCN call (adj = I  =>  A @ fts == fts).
# ----------------------------------------------------------------------------
def _linear_kernel(x_ref, wt_ref, b_ref, out_ref, *, apply_relu):
    y = jnp.dot(x_ref[...], wt_ref[...], preferred_element_type=jnp.float32)
    y = y + b_ref[...]
    if apply_relu:
        y = jnp.maximum(y, 0.0)
    out_ref[...] = y.astype(out_ref.dtype)


def linear_pallas(x, wt, bias, *, apply_relu=False, tm=256):
    """x: (M, K) f32, wt: (K, F) f32 (already transposed), bias: (1, F) f32."""
    m, k = x.shape
    f = wt.shape[1]
    tm = min(tm, _round_up(m, 8))
    m_pad = _round_up(m, tm)
    if m_pad != m:
        x = jnp.pad(x, ((0, m_pad - m), (0, 0)))

    out = pl.pallas_call(
        functools.partial(_linear_kernel, apply_relu=apply_relu),
        out_shape=jax.ShapeDtypeStruct((m_pad, f), jnp.float32),
        grid_spec=pltpu.PrefetchScalarGridSpec(
            num_scalar_prefetch=0,
            grid=(m_pad // tm,),
            in_specs=[
                pl.BlockSpec((tm, k), lambda i: (i, 0)),
                pl.BlockSpec((k, f), lambda i: (0, 0)),
                pl.BlockSpec((1, f), lambda i: (0, 0)),
            ],
            out_specs=pl.BlockSpec((tm, f), lambda i: (i, 0)),
        ),
        compiler_params=pltpu.CompilerParams(dimension_semantics=("parallel",)),
    )(x, wt, bias)
    return out[:m]


# ----------------------------------------------------------------------------
# Kernel 2: tiled adjacency matmul  out = adj @ fts + bias
#   Grid = (row tiles, k tiles); VMEM f32 accumulator; bias added at finalize.
# ----------------------------------------------------------------------------
def _adj_kernel(adj_ref, fts_ref, b_ref, out_ref, acc_ref):
    @pl.when(pl.program_id(1) == 0)
    def _():
        acc_ref[...] = jnp.zeros_like(acc_ref)

    acc_ref[...] += jnp.dot(
        adj_ref[...], fts_ref[...], preferred_element_type=jnp.float32
    )

    @pl.when(pl.program_id(1) == pl.num_programs(1) - 1)
    def _():
        out_ref[...] = (acc_ref[...] + b_ref[...]).astype(out_ref.dtype)


def adj_matmul_pallas(adj, fts, bias, *, max_tile=512):
    """adj: (N, N) f32, fts: (N, F) f32, bias: (1, F) f32 -> (N, F) f32."""
    n = adj.shape[0]
    f = fts.shape[1]
    # Tile size: multiple of 128 (lane constraint on adj columns), capped at max_tile.
    t = min(max_tile, _round_up(n, 128))
    n_pad = _round_up(n, t)
    if n_pad != n:
        adj = jnp.pad(adj, ((0, n_pad - n), (0, n_pad - n)))
        fts = jnp.pad(fts, ((0, n_pad - n), (0, 0)))

    out = pl.pallas_call(
        _adj_kernel,
        out_shape=jax.ShapeDtypeStruct((n_pad, f), jnp.float32),
        grid_spec=pltpu.PrefetchScalarGridSpec(
            num_scalar_prefetch=0,
            grid=(n_pad // t, n_pad // t),
            in_specs=[
                pl.BlockSpec((t, t), lambda i, kk: (i, kk)),
                pl.BlockSpec((t, f), lambda i, kk: (kk, 0)),
                pl.BlockSpec((1, f), lambda i, kk: (0, 0)),
            ],
            out_specs=pl.BlockSpec((t, f), lambda i, kk: (i, 0)),
            scratch_shapes=[pltpu.VMEM((t, f), jnp.float32)],
        ),
        compiler_params=pltpu.CompilerParams(
            dimension_semantics=("parallel", "arbitrary"),
        ),
    )(adj, fts, bias)
    return out[:n]


# ----------------------------------------------------------------------------
# Parameter init / prep (transposes + bias reshapes hoisted out of the hot path)
# ----------------------------------------------------------------------------
def xavier_uniform(key, out_ft, in_ft):
    limit = jnp.sqrt(6.0 / (in_ft + out_ft))
    return jax.random.uniform(key, (out_ft, in_ft), jnp.float32, -limit, limit)


def init_grlc_params(key, n_in, n_h, dim_x=2):
    k0, k1 = jax.random.split(key)
    hid = n_h * dim_x
    return {
        "gcn0": {
            "w": xavier_uniform(k0, hid, n_in),
            "b_fc": jnp.zeros((hid,), jnp.float32),
            "b_gcn": jnp.zeros((hid,), jnp.float32),
        },
        "gcn1": {
            "w": xavier_uniform(k1, n_h, hid),
            "b_fc": jnp.zeros((n_h,), jnp.float32),
            "b_gcn": jnp.zeros((n_h,), jnp.float32),
        },
    }


def prepare_params(params):
    g0, g1 = params["gcn0"], params["gcn1"]
    return {
        # gcn_0 always runs with identity adjacency -> both biases collapse.
        "w0t": g0["w"].T,                                        # (n_in, hid)
        "b0": (g0["b_fc"] + g0["b_gcn"]).reshape(1, -1),         # (1, hid)
        "w1t": g1["w"].T,                                        # (hid, n_h)
        "b1_fc": g1["b_fc"].reshape(1, -1),                      # (1, n_h)
        "b1_gcn": g1["b_gcn"].reshape(1, -1),                    # (1, n_h)
    }


# ----------------------------------------------------------------------------
# GRLC forward (eval mode, useact=False, useA=True — the defaults).
# NOTE: assumes the "I" adjacency passed to the reference module is the identity
#       matrix (how GRLC is used), so those matmuls are skipped entirely.
# ----------------------------------------------------------------------------
def _grlc_forward_impl(prep, seq_a, seq_p, seq_n_list, adj):
    n = seq_a.shape[0]
    n_h = prep["w1t"].shape[1]
    n_neg = len(seq_n_list)

    # --- gcn_0 (+ReLU) for every branch in a single linear kernel launch ------
    x_all = jnp.concatenate([seq_a, seq_p] + list(seq_n_list), axis=0)   # (B*N, n_in)
    h0_all = linear_pallas(x_all, prep["w0t"], prep["b0"], apply_relu=True)

    # --- gcn_1 linear part (fc bias only) for every branch, one launch --------
    f_all = linear_pallas(h0_all, prep["w1t"], prep["b1_fc"], apply_relu=False)

    # anchor branch: identity adjacency -> just add the GCN bias
    h_a = f_all[:n] + prep["b1_gcn"]

    # positive + negatives: single adjacency pass over lane-concatenated features
    p_cnt = 1 + n_neg
    f_pn = (
        f_all[n:]
        .reshape(p_cnt, n, n_h)
        .transpose(1, 0, 2)
        .reshape(n, p_cnt * n_h)
    )
    b_cat = jnp.tile(prep["b1_gcn"], (1, p_cnt))
    out_cat = adj_matmul_pallas(adj, f_pn, b_cat)                        # (N, p_cnt*n_h)
    out_pn = out_cat.reshape(n, p_cnt, n_h).transpose(1, 0, 2)           # (p_cnt, N, n_h)

    h_p = out_pn[0]
    h_n_list = [out_pn[1 + i] for i in range(n_neg)]
    return h_a, h_p, h_n_list


grlc_forward = jax.jit(_grlc_forward_impl)


# ----------------------------------------------------------------------------
# Pure-JAX reference (explicit I matmuls, mirrors the PyTorch module exactly)
# ----------------------------------------------------------------------------
def _gcn_ref(x, adj, w, b_fc, b_gcn, relu):
    out = adj @ (x @ w.T + b_fc) + b_gcn
    return jnp.maximum(out, 0.0) if relu else out


def _grlc_ref(params, seq_a, seq_p, seq_n_list, adj, I):
    g0, g1 = params["gcn0"], params["gcn1"]
    h_a_0 = _gcn_ref(seq_a, I, g0["w"], g0["b_fc"], g0["b_gcn"], True)
    h_a = _gcn_ref(h_a_0, I, g1["w"], g1["b_fc"], g1["b_gcn"], False)
    h_p_0 = _gcn_ref(seq_p, I, g0["w"], g0["b_fc"], g0["b_gcn"], True)
    h_p = _gcn_ref(h_p_0, adj, g1["w"], g1["b_fc"], g1["b_gcn"], False)
    h_ns = []
    for sn in seq_n_list:
        h_n_0 = _gcn_ref(sn, I, g0["w"], g0["b_fc"], g0["b_gcn"], True)
        h_ns.append(_gcn_ref(h_n_0, adj, g1["w"], g1["b_fc"], g1["b_gcn"], False))
    return h_a, h_p, h_ns


if __name__ == "__main__":
    # small shapes: N nodes, n_in input features, n_h hidden, dim_x=2
    N, n_in, n_h, dim_x = 16, 32, 16, 2
    n_neg = 2

    key = jax.random.PRNGKey(0)
    kp, ka, kpp, kn, kadj = jax.random.split(key, 5)

    params = init_grlc_params(kp, n_in, n_h, dim_x)
    prep = prepare_params(params)

    seq_a = jax.random.normal(ka, (N, n_in), jnp.float32)
    seq_p = jax.random.normal(kpp, (N, n_in), jnp.float32)
    seq_n_list = [
        jax.random.normal(jax.random.fold_in(kn, i), (N, n_in), jnp.float32)
        for i in range(n_neg)
    ]
    # row-normalized random adjacency and identity "I"
    adj_raw = jax.random.uniform(kadj, (N, N), jnp.float32)
    adj = adj_raw / jnp.sum(adj_raw, axis=1, keepdims=True)
    I = jnp.eye(N, dtype=jnp.float32)

    h_a, h_p, h_n_list = grlc_forward(prep, seq_a, seq_p, seq_n_list, adj)
    jax.block_until_ready((h_a, h_p, h_n_list))

    # verify against pure-JAX reference (uses the explicit identity matrix)
    r_a, r_p, r_n_list = _grlc_ref(params, seq_a, seq_p, seq_n_list, adj, I)
    assert h_a.shape == (N, n_h) and h_p.shape == (N, n_h)
    assert jnp.allclose(h_a, r_a, atol=1e-4, rtol=1e-4)
    assert jnp.allclose(h_p, r_p, atol=1e-4, rtol=1e-4)
    for hn, rn in zip(h_n_list, r_n_list):
        assert hn.shape == (N, n_h)
        assert jnp.allclose(hn, rn, atol=1e-4, rtol=1e-4)

    print("KERNEL_OK")
</pallas_src>

<mosaic_0001>
module attributes {stable_mosaic.version = 11 : i64} {
  func.func @_linear_kernel(%arg0: i32, %arg1: memref<64x32xf32, #tpu.memory_space<vmem>>, %arg2: memref<32x32xf32, #tpu.memory_space<vmem>>, %arg3: memref<1x32xf32, #tpu.memory_space<vmem>>, %arg4: memref<64x32xf32, #tpu.memory_space<vmem>>) attributes {dimension_semantics = [#tpu.dimension_semantics<parallel>], iteration_bounds = array<i64: 1>, scalar_prefetch = 0 : i64, scratch_operands = 0 : i64, tpu.core_type = #tpu.core_type<tc>, window_params = [{transform_indices = @transform_0, window_bounds = array<i64: 64, 32>}, {pipeline_mode = #tpu.pipeline_mode<synchronous>, transform_indices = @transform_1, window_bounds = array<i64: 32, 32>}, {pipeline_mode = #tpu.pipeline_mode<synchronous>, transform_indices = @transform_2, window_bounds = array<i64: 1, 32>}, {transform_indices = @transform_3, window_bounds = array<i64: 64, 32>}]} {
    %c0 = arith.constant 0 : index
    %c0_0 = arith.constant 0 : index
    %0 = vector.load %arg1[%c0, %c0_0] : memref<64x32xf32, #tpu.memory_space<vmem>>, vector<64x32xf32>
    %c0_1 = arith.constant 0 : index
    %c0_2 = arith.constant 0 : index
    %1 = vector.load %arg2[%c0_1, %c0_2] : memref<32x32xf32, #tpu.memory_space<vmem>>, vector<32x32xf32>
    %cst = arith.constant dense<0.000000e+00> : vector<64x32xf32>
    %2 = tpu.matmul %0, %1, %cst {dimension_numbers = #tpu.dot_dimension_numbers<[1], [0], [0], [1], [0, 0, 1, 1], [], []>} : vector<64x32xf32>, vector<32x32xf32>, vector<64x32xf32> -> vector<64x32xf32>
    %c0_3 = arith.constant 0 : index
    %c0_4 = arith.constant 0 : index
    %3 = vector.load %arg3[%c0_3, %c0_4] : memref<1x32xf32, #tpu.memory_space<vmem>>, vector<1x32xf32>
    %4 = vector.broadcast %3 : vector<1x32xf32> to vector<64x32xf32>
    %5 = arith.addf %2, %4 : vector<64x32xf32>
    %cst_5 = arith.constant 0.000000e+00 : f32
    %6 = vector.broadcast %cst_5 : f32 to vector<64x32xf32>
    %7 = arith.maximumf %5, %6 : vector<64x32xf32>
    %c0_6 = arith.constant 0 : index
    %c0_7 = arith.constant 0 : index
    %8 = vector.load %arg4[%c0_6, %c0_7] : memref<64x32xf32, #tpu.memory_space<vmem>>, vector<64x32xf32>
    tpu.vector_store %arg4[%c0_6, %c0_7], %7 {strides = array<i32>} : memref<64x32xf32, #tpu.memory_space<vmem>>, vector<64x32xf32>,
    return
  }
  func.func @transform_0(%arg0: i32) -> (i32, i32) {
    %c0_i32 = arith.constant 0 : i32
    %c0_i32_0 = arith.constant 0 : i32
    return %arg0, %c0_i32 : i32, i32
  }
  func.func @transform_1(%arg0: i32) -> (i32, i32) {
    %c0_i32 = arith.constant 0 : i32
    %c0_i32_0 = arith.constant 0 : i32
    %c0_i32_1 = arith.constant 0 : i32
    return %c0_i32, %c0_i32_0 : i32, i32
  }
  func.func @transform_2(%arg0: i32) -> (i32, i32) {
    %c0_i32 = arith.constant 0 : i32
    %c0_i32_0 = arith.constant 0 : i32
    %c0_i32_1 = arith.constant 0 : i32
    return %c0_i32, %c0_i32_0 : i32, i32
  }
  func.func @transform_3(%arg0: i32) -> (i32, i32) {
    %c0_i32 = arith.constant 0 : i32
    %c0_i32_0 = arith.constant 0 : i32
    return %arg0, %c0_i32 : i32, i32
  }
}

module attributes {stable_mosaic.version = 11 : i64} {
  func.func @_linear_kernel(%arg0: i32, %arg1: memref<64x32xf32, #tpu.memory_space<vmem>>, %arg2: memref<32x16xf32, #tpu.memory_space<vmem>>, %arg3: memref<1x16xf32, #tpu.memory_space<vmem>>, %arg4: memref<64x16xf32, #tpu.memory_space<vmem>>) attributes {dimension_semantics = [#tpu.dimension_semantics<parallel>], iteration_bounds = array<i64: 1>, scalar_prefetch = 0 : i64, scratch_operands = 0 : i64, tpu.core_type = #tpu.core_type<tc>, window_params = [{transform_indices = @transform_0, window_bounds = array<i64: 64, 32>}, {pipeline_mode = #tpu.pipeline_mode<synchronous>, transform_indices = @transform_1, window_bounds = array<i64: 32, 16>}, {pipeline_mode = #tpu.pipeline_mode<synchronous>, transform_indices = @transform_2, window_bounds = array<i64: 1, 16>}, {transform_indices = @transform_3, window_bounds = array<i64: 64, 16>}]} {
    %c0 = arith.constant 0 : index
    %c0_0 = arith.constant 0 : index
    %0 = vector.load %arg1[%c0, %c0_0] : memref<64x32xf32, #tpu.memory_space<vmem>>, vector<64x32xf32>
    %c0_1 = arith.constant 0 : index
    %c0_2 = arith.constant 0 : index
    %1 = vector.load %arg2[%c0_1, %c0_2] : memref<32x16xf32, #tpu.memory_space<vmem>>, vector<32x16xf32>
    %cst = arith.constant dense<0.000000e+00> : vector<64x16xf32>
    %2 = tpu.matmul %0, %1, %cst {dimension_numbers = #tpu.dot_dimension_numbers<[1], [0], [0], [1], [0, 0, 1, 1], [], []>} : vector<64x32xf32>, vector<32x16xf32>, vector<64x16xf32> -> vector<64x16xf32>
    %c0_3 = arith.constant 0 : index
    %c0_4 = arith.constant 0 : index
    %3 = vector.load %arg3[%c0_3, %c0_4] : memref<1x16xf32, #tpu.memory_space<vmem>>, vector<1x16xf32>
    %4 = vector.broadcast %3 : vector<1x16xf32> to vector<64x16xf32>
    %5 = arith.addf %2, %4 : vector<64x16xf32>
    %c0_5 = arith.constant 0 : index
    %c0_6 = arith.constant 0 : index
    %6 = vector.load %arg4[%c0_5, %c0_6] : memref<64x16xf32, #tpu.memory_space<vmem>>, vector<64x16xf32>
    tpu.vector_store %arg4[%c0_5, %c0_6], %5 {strides = array<i32>} : memref<64x16xf32, #tpu.memory_space<vmem>>, vector<64x16xf32>,
    return
  }
  func.func @transform_0(%arg0: i32) -> (i32, i32) {
    %c0_i32 = arith.constant 0 : i32
    %c0_i32_0 = arith.constant 0 : i32
    return %arg0, %c0_i32 : i32, i32
  }
  func.func @transform_1(%arg0: i32) -> (i32, i32) {
    %c0_i32 = arith.constant 0 : i32
    %c0_i32_0 = arith.constant 0 : i32
    %c0_i32_1 = arith.constant 0 : i32
    return %c0_i32, %c0_i32_0 : i32, i32
  }
  func.func @transform_2(%arg0: i32) -> (i32, i32) {
    %c0_i32 = arith.constant 0 : i32
    %c0_i32_0 = arith.constant 0 : i32
    %c0_i32_1 = arith.constant 0 : i32
    return %c0_i32, %c0_i32_0 : i32, i32
  }
  func.func @transform_3(%arg0: i32) -> (i32, i32) {
    %c0_i32 = arith.constant 0 : i32
    %c0_i32_0 = arith.constant 0 : i32
    return %arg0, %c0_i32 : i32, i32
  }
}

module attributes {stable_mosaic.version = 11 : i64} {
  func.func @_adj_kernel(%arg0: i32, %arg1: i32, %arg2: memref<128x128xf32, #tpu.memory_space<vmem>>, %arg3: memref<128x48xf32, #tpu.memory_space<vmem>>, %arg4: memref<1x48xf32, #tpu.memory_space<vmem>>, %arg5: memref<128x48xf32, #tpu.memory_space<vmem>>, %arg6: memref<128x48xf32, #tpu.memory_space<vmem>>) attributes {dimension_semantics = [#tpu.dimension_semantics<parallel>, #tpu.dimension_semantics<arbitrary>], iteration_bounds = array<i64: 1, 1>, scalar_prefetch = 0 : i64, scratch_operands = 1 : i64, tpu.core_type = #tpu.core_type<tc>, window_params = [{transform_indices = @transform_0, window_bounds = array<i64: 128, 128>}, {transform_indices = @transform_1, window_bounds = array<i64: 128, 48>}, {pipeline_mode = #tpu.pipeline_mode<synchronous>, transform_indices = @transform_2, window_bounds = array<i64: 1, 48>}, {transform_indices = @transform_3, window_bounds = array<i64: 128, 48>}]} {
    %c0_i32 = arith.constant 0 : i32
    %0 = arith.cmpi eq, %arg1, %c0_i32 : i32
    %1 = arith.extui %0 : i1 to i32
    %c0_i32_0 = arith.constant 0 : i32
    %2 = arith.cmpi ne, %1, %c0_i32_0 : i32
    scf.if %2 {
      %cst_10 = arith.constant 0.000000e+00 : f32
      %12 = vector.broadcast %cst_10 : f32 to vector<128x48xf32>
      %c0_11 = arith.constant 0 : index
      %c0_12 = arith.constant 0 : index
      %13 = vector.load %arg6[%c0_11, %c0_12] : memref<128x48xf32, #tpu.memory_space<vmem>>, vector<128x48xf32>
      tpu.vector_store %arg6[%c0_11, %c0_12], %12 {strides = array<i32>} : memref<128x48xf32, #tpu.memory_space<vmem>>, vector<128x48xf32>,
    } else {
    }
    %c0 = arith.constant 0 : index
    %c0_1 = arith.constant 0 : index
    %3 = vector.load %arg6[%c0, %c0_1] : memref<128x48xf32, #tpu.memory_space<vmem>>, vector<128x48xf32>
    %c0_2 = arith.constant 0 : index
    %c0_3 = arith.constant 0 : index
    %4 = vector.load %arg2[%c0_2, %c0_3] : memref<128x128xf32, #tpu.memory_space<vmem>>, vector<128x128xf32>
    %c0_4 = arith.constant 0 : index
    %c0_5 = arith.constant 0 : index
    %5 = vector.load %arg3[%c0_4, %c0_5] : memref<128x48xf32, #tpu.memory_space<vmem>>, vector<128x48xf32>
    %cst = arith.constant dense<0.000000e+00> : vector<128x48xf32>
    %6 = tpu.matmul %4, %5, %cst {dimension_numbers = #tpu.dot_dimension_numbers<[1], [0], [0], [1], [0, 0, 1, 1], [], []>} : vector<128x128xf32>, vector<128x48xf32>, vector<128x48xf32> -> vector<128x48xf32>
    %7 = arith.addf %3, %6 : vector<128x48xf32>
    %c0_6 = arith.constant 0 : index
    %c0_7 = arith.constant 0 : index
    %8 = vector.load %arg6[%c0_6, %c0_7] : memref<128x48xf32, #tpu.memory_space<vmem>>, vector<128x48xf32>
    tpu.vector_store %arg6[%c0_6, %c0_7], %7 {strides = array<i32>} : memref<128x48xf32, #tpu.memory_space<vmem>>, vector<128x48xf32>,
    %c0_i32_8 = arith.constant 0 : i32
    %9 = arith.cmpi eq, %arg1, %c0_i32_8 : i32
    %10 = arith.extui %9 : i1 to i32
    %c0_i32_9 = arith.constant 0 : i32
    %11 = arith.cmpi ne, %10, %c0_i32_9 : i32
    scf.if %11 {
      %c0_10 = arith.constant 0 : index
      %c0_11 = arith.constant 0 : index
      %12 = vector.load %arg6[%c0_10, %c0_11] : memref<128x48xf32, #tpu.memory_space<vmem>>, vector<128x48xf32>
      %c0_12 = arith.constant 0 : index
      %c0_13 = arith.constant 0 : index
      %13 = vector.load %arg4[%c0_12, %c0_13] : memref<1x48xf32, #tpu.memory_space<vmem>>, vector<1x48xf32>
      %14 = vector.broadcast %13 : vector<1x48xf32> to vector<128x48xf32>
      %15 = arith.addf %12, %14 : vector<128x48xf32>
      %c0_14 = arith.constant 0 : index
      %c0_15 = arith.constant 0 : index
      %16 = vector.load %arg5[%c0_14, %c0_15] : memref<128x48xf32, #tpu.memory_space<vmem>>, vector<128x48xf32>
      tpu.vector_store %arg5[%c0_14, %c0_15], %15 {strides = array<i32>} : memref<128x48xf32, #tpu.memory_space<vmem>>, vector<128x48xf32>,
    } else {
    }
    return
  }
  func.func @transform_0(%arg0: i32, %arg1: i32) -> (i32, i32) {
    %c0_i32 = arith.constant 0 : i32
    return %arg0, %arg1 : i32, i32
  }
  func.func @transform_1(%arg0: i32, %arg1: i32) -> (i32, i32) {
    %c0_i32 = arith.constant 0 : i32
    %c0_i32_0 = arith.constant 0 : i32
    return %arg1, %c0_i32 : i32, i32
  }
  func.func @transform_2(%arg0: i32, %arg1: i32) -> (i32, i32) {
    %c0_i32 = arith.constant 0 : i32
    %c0_i32_0 = arith.constant 0 : i32
    %c0_i32_1 = arith.constant 0 : i32
    return %c0_i32, %c0_i32_0 : i32, i32
  }
  func.func @transform_3(%arg0: i32, %arg1: i32) -> (i32, i32) {
    %c0_i32 = arith.constant 0 : i32
    %c0_i32_0 = arith.constant 0 : i32
    return %arg0, %c0_i32 : i32, i32
  }
}

</mosaic_0001>

<bundles_post_ra>
// kernel: _grlc_forward_impl.3
= control target key start
LH: loop header
LB: loop body
LE: loop exit
PB: predicated region body
PF: predicated region fallthrough
CT: control target
= control target key end

     0   :  { %vm30_vm0 = vcmask 261120   ;;  %s236_s1 = inlined_call_operand.vmem [shape: f32[32,32], index: 1, kind: input, shape index: {}]   ;;  %s237_s0 = inlined_call_operand.vmem [shape: f32[64,32], index: 0, kind: input, shape index: {}]   ;;  %s238_s2 = inlined_call_operand.vmem [shape: f32[1,32], index: 2, kind: input, shape index: {}]   ;;  %s239_s3 = inlined_call_operand.vmem [shape: f32[64,32], index: 3, kind: output, shape index: {}]  }
   0x1   :  { %v25_v0 = vld [vmem:[%s236_s1 + $0x18] sm:$0xff]  ;;  %v24_v1 = vld [vmem:[%s236_s1 + $0x10] sm:$0xff]  ;;  %v23_v2 = vld [vmem:[%s236_s1 + $0x8] sm:$0xff] }
   0x2   :  { %125 = vmatpush.msra.mxu2 %v25_v0  ;;  %126 = vmatpush.msra.mxu3 %v25_v0  ;;  %v22_v3 = vld [vmem:[%s236_s1] sm:$0xff]  ;;  %v20_v5 = vld [vmem:[%s237_s0 + $0x30] sm:$0xff]  ;;  %v19_v8 = vld [vmem:[%s237_s0 + $0x28] sm:$0xff] }
   0x3   :  { %67 = vmatpush.msra.mxu0 %v25_v0  ;;  %124 = vmatpush.msra.mxu1 %v25_v0  ;;  %v18_v4 = vld [vmem:[%s237_s0 + $0x20] sm:$0xff]  ;;  %v16_v7 = vld [vmem:[%s237_s0 + $0x10] sm:$0xff]  ;;  %v21_v9 = vld [vmem:[%s237_s0 + $0x38] sm:$0xff] }
   0x4   :  { %128 = vmatpush.msra.mxu2 %v24_v1  ;;  %129 = vmatpush.msra.mxu3 %v24_v1  ;;  %v14_v6 = vld [vmem:[%s237_s0] sm:$0xff]  ;;  %v15_v10 = vld [vmem:[%s237_s0 + $0x8] sm:$0xff]  ;;  %v17_v11 = vld [vmem:[%s237_s0 + $0x18] sm:$0xff] }
   0x5   :  { %68 = vmatpush.msra.mxu0 %v24_v1  ;;  %127 = vmatpush.msra.mxu1 %v24_v1  ;;  %v136_v12 = vld [vmem:[%s238_s2] ss:$0 sm:$0xff] }
   0x6   :  { %131 = vmatpush.msra.mxu2 %v23_v2  ;;  %132 = vmatpush.msra.mxu3 %v23_v2 }
   0x7   :  { %69 = vmatpush.msra.mxu0 %v23_v2  ;;  %130 = vmatpush.msra.mxu1 %v23_v2 }
   0x8   :  { %134 = vmatpush.msra.mxu2 %v22_v3  ;;  %135 = vmatpush.msra.mxu3 %v22_v3 }
   0x9   :  { %120 = vmatmul.msk.f32.vlgmr.msra.gmra.mxu2 %vm30_vm0, %v18_v4  ;;  %122 = vmatmul.msk.f32.vlgmr.msra.gmra.mxu3 %vm30_vm0, %v20_v5 }
   0xa   :  { %70 = vmatpush.msra.mxu0 %v22_v3  ;;  %133 = vmatpush.msra.mxu1 %v22_v3 }
   0xb   :  { %116 = vmatmul.msk.f32.vlgmr.msra.gmra.mxu0 %vm30_vm0, %v14_v6  ;;  %118 = vmatmul.msk.f32.vlgmr.msra.gmra.mxu1 %vm30_vm0, %v16_v7 }
  0x11   :  { %121 = vmatmul.msk.f32.gmra.mxu2 %vm30_vm0, %v19_v8  ;;  %123 = vmatmul.msk.f32.gmra.mxu3 %vm30_vm0, %v21_v9 }
  0x13   :  { %117 = vmatmul.msk.f32.gmra.mxu0 %vm30_vm0, %v15_v10  ;;  %119 = vmatmul.msk.f32.gmra.mxu1 %vm30_vm0, %v17_v11 }
  0x88   :  { %v72_v13 = vpop.f32.mrf.mxu0  ;;  %v78_v14 = vpop.f32.mrf.mxu1 }
  0x89   :  { %v73_v15 = vadd.f32 %v136_v12, %v72_v13  ;;  %v79_v16 = vadd.f32 %v136_v12, %v78_v14 }
  0x8b   :  { %v96_v17 = vmax.f32 %v73_v15, 0.0  ;;  %v98_v18 = vmax.f32 %v79_v16, 0.0 }
  0x8c   :  { %v84_v19 = vpop.f32.mrf.mxu2  ;;  %v90_v20 = vpop.f32.mrf.mxu3 }
  0x8d   :  { %104 = vst.msk [vmem:[%s239_s3] sm:$0xff] %vm30_vm0, %v96_v17  ;;  %v85_v21 = vadd.f32 %v136_v12, %v84_v19  ;;  %v91_v22 = vadd.f32 %v136_v12, %v90_v20 }
  0x8e   :  { %106 = vst.msk [vmem:[%s239_s3 + $0x10] sm:$0xff] %vm30_vm0, %v98_v18 }
  0x8f   :  { %v100_v23 = vmax.f32 %v85_v21, 0.0  ;;  %v102_v24 = vmax.f32 %v91_v22, 0.0 }
  0x90   :  { %v75_v25 = vpop.f32.mrf.mxu0  ;;  %v81_v26 = vpop.f32.mrf.mxu1 }
  0x91   :  { %108 = vst.msk [vmem:[%s239_s3 + $0x20] sm:$0xff] %vm30_vm0, %v100_v23  ;;  %v76_v27 = vadd.f32 %v136_v12, %v75_v25  ;;  %v82_v28 = vadd.f32 %v136_v12, %v81_v26 }
  0x92   :  { %110 = vst.msk [vmem:[%s239_s3 + $0x30] sm:$0xff] %vm30_vm0, %v102_v24 }
  0x93   :  { %v97_v29 = vmax.f32 %v76_v27, 0.0  ;;  %v99_v30 = vmax.f32 %v82_v28, 0.0 }
  0x94   :  { %v87_v31 = vpop.f32.mrf.mxu2  ;;  %v93_v32 = vpop.f32.mrf.mxu3 }
  0x95   :  { %105 = vst.msk [vmem:[%s239_s3 + $0x8] sm:$0xff] %vm30_vm0, %v97_v29  ;;  %v88_v33 = vadd.f32 %v136_v12, %v87_v31  ;;  %v94_v34 = vadd.f32 %v136_v12, %v93_v32 }
  0x96   :  { %107 = vst.msk [vmem:[%s239_s3 + $0x18] sm:$0xff] %vm30_vm0, %v99_v30 }
  0x97   :  { %v101_v35 = vmax.f32 %v88_v33, 0.0  ;;  %v103_v36 = vmax.f32 %v94_v34, 0.0 }
  0x99   :  { %109 = vst.msk [vmem:[%s239_s3 + $0x28] sm:$0xff] %vm30_vm0, %v101_v35 }
  0x9a   :  { %111 = vst.msk [vmem:[%s239_s3 + $0x38] sm:$0xff] %vm30_vm0, %v103_v36 }

// kernel: _grlc_forward_impl.4
= control target key start
LH: loop header
LB: loop body
LE: loop exit
PB: predicated region body
PF: predicated region fallthrough
CT: control target
= control target key end

     0   :  { %vm30_vm0 = vcmask 261120   ;;  %vm96_vm1 = vcmask 130048   ;;  %s229_s1 = inlined_call_operand.vmem [shape: f32[32,16], index: 1, kind: input, shape index: {}]   ;;  %s230_s0 = inlined_call_operand.vmem [shape: f32[64,32], index: 0, kind: input, shape index: {}]   ;;  %s231_s2 = inlined_call_operand.vmem [shape: f32[1,16], index: 2, kind: input, shape index: {}]   ;;  %s232_s3 = inlined_call_operand.vmem [shape: f32[64,16], index: 3, kind: output, shape index: {}]  }
   0x1   :  { %v25_v0 = vld [vmem:[%s229_s1 + $0x18] sm:$0xff]  ;;  %v24_v1 = vld [vmem:[%s229_s1 + $0x10] sm:$0xff]  ;;  %v23_v2 = vld [vmem:[%s229_s1 + $0x8] sm:$0xff] }
   0x2   :  { %118 = vmatpush.msra.mxu2 %v25_v0  ;;  %119 = vmatpush.msra.mxu3 %v25_v0  ;;  %v22_v3 = vld [vmem:[%s229_s1] sm:$0xff]  ;;  %v20_v5 = vld [vmem:[%s230_s0 + $0x30] sm:$0xff]  ;;  %v19_v8 = vld [vmem:[%s230_s0 + $0x28] sm:$0xff] }
   0x3   :  { %67 = vmatpush.msra.mxu0 %v25_v0  ;;  %117 = vmatpush.msra.mxu1 %v25_v0  ;;  %v18_v4 = vld [vmem:[%s230_s0 + $0x20] sm:$0xff]  ;;  %v16_v7 = vld [vmem:[%s230_s0 + $0x10] sm:$0xff]  ;;  %v21_v9 = vld [vmem:[%s230_s0 + $0x38] sm:$0xff] }
   0x4   :  { %121 = vmatpush.msra.mxu2 %v24_v1  ;;  %122 = vmatpush.msra.mxu3 %v24_v1  ;;  %v14_v6 = vld [vmem:[%s230_s0] sm:$0xff]  ;;  %v15_v10 = vld [vmem:[%s230_s0 + $0x8] sm:$0xff]  ;;  %v17_v11 = vld [vmem:[%s230_s0 + $0x18] sm:$0xff] }
   0x5   :  { %68 = vmatpush.msra.mxu0 %v24_v1  ;;  %120 = vmatpush.msra.mxu1 %v24_v1  ;;  %v129_v12 = vld [vmem:[%s231_s2] ss:$0 sm:$0xff] }
   0x6   :  { %124 = vmatpush.msra.mxu2 %v23_v2  ;;  %125 = vmatpush.msra.mxu3 %v23_v2 }
   0x7   :  { %69 = vmatpush.msra.mxu0 %v23_v2  ;;  %123 = vmatpush.msra.mxu1 %v23_v2 }
   0x8   :  { %127 = vmatpush.msra.mxu2 %v22_v3  ;;  %128 = vmatpush.msra.mxu3 %v22_v3 }
   0x9   :  { %113 = vmatmul.msk.f32.vlgmr.msra.gmra.mxu2 %vm30_vm0, %v18_v4  ;;  %115 = vmatmul.msk.f32.vlgmr.msra.gmra.mxu3 %vm30_vm0, %v20_v5 }
   0xa   :  { %70 = vmatpush.msra.mxu0 %v22_v3  ;;  %126 = vmatpush.msra.mxu1 %v22_v3 }
   0xb   :  { %109 = vmatmul.msk.f32.vlgmr.msra.gmra.mxu0 %vm30_vm0, %v14_v6  ;;  %111 = vmatmul.msk.f32.vlgmr.msra.gmra.mxu1 %vm30_vm0, %v16_v7 }
  0x11   :  { %114 = vmatmul.msk.f32.gmra.mxu2 %vm30_vm0, %v19_v8  ;;  %116 = vmatmul.msk.f32.gmra.mxu3 %vm30_vm0, %v21_v9 }
  0x13   :  { %110 = vmatmul.msk.f32.gmra.mxu0 %vm30_vm0, %v15_v10  ;;  %112 = vmatmul.msk.f32.gmra.mxu1 %vm30_vm0, %v17_v11 }
  0x88   :  { %v72_v13 = vpop.f32.mrf.mxu0  ;;  %v78_v14 = vpop.f32.mrf.mxu1 }
  0x89   :  { %v73_v15 = vadd.f32 %v129_v12, %v72_v13  ;;  %v79_v16 = vadd.f32 %v129_v12, %v78_v14 }
  0x8b   :  { %97 = vst.msk [vmem:[%s232_s3] sm:$0xff] %vm96_vm1, %v73_v15 }
  0x8c   :  { %99 = vst.msk [vmem:[%s232_s3 + $0x10] sm:$0xff] %vm96_vm1, %v79_v16  ;;  %v84_v17 = vpop.f32.mrf.mxu2  ;;  %v90_v18 = vpop.f32.mrf.mxu3 }
  0x8d   :  { %v85_v19 = vadd.f32 %v129_v12, %v84_v17  ;;  %v91_v20 = vadd.f32 %v129_v12, %v90_v18 }
  0x8f   :  { %101 = vst.msk [vmem:[%s232_s3 + $0x20] sm:$0xff] %vm96_vm1, %v85_v19 }
  0x90   :  { %103 = vst.msk [vmem:[%s232_s3 + $0x30] sm:$0xff] %vm96_vm1, %v91_v20  ;;  %v75_v21 = vpop.f32.mrf.mxu0  ;;  %v81_v22 = vpop.f32.mrf.mxu1 }
  0x91   :  { %v76_v23 = vadd.f32 %v129_v12, %v75_v21  ;;  %v82_v24 = vadd.f32 %v129_v12, %v81_v22 }
  0x93   :  { %98 = vst.msk [vmem:[%s232_s3 + $0x8] sm:$0xff] %vm96_vm1, %v76_v23 }
  0x94   :  { %100 = vst.msk [vmem:[%s232_s3 + $0x18] sm:$0xff] %vm96_vm1, %v82_v24  ;;  %v87_v25 = vpop.f32.mrf.mxu2  ;;  %v93_v26 = vpop.f32.mrf.mxu3 }
  0x95   :  { %v88_v27 = vadd.f32 %v129_v12, %v87_v25  ;;  %v94_v28 = vadd.f32 %v129_v12, %v93_v26 }
  0x97   :  { %102 = vst.msk [vmem:[%s232_s3 + $0x28] sm:$0xff] %vm96_vm1, %v88_v27 }
  0x98   :  { %104 = vst.msk [vmem:[%s232_s3 + $0x38] sm:$0xff] %vm96_vm1, %v94_v28 }

// kernel: _grlc_forward_impl.5
= control target key start
LH: loop header
LB: loop body
LE: loop exit
PB: predicated region body
PF: predicated region fallthrough
CT: control target
= control target key end

     0   :  { %vm18_vm0 = vcmask 392192   ;;  %v290_v15 = vmov 0.0   ;;  %s524_s1 = inlined_call_operand.vmem [shape: f32[128,48], index: 1, kind: input, shape index: {}]   ;;  %s525_s2 = inlined_call_operand.vmem [shape: f32[1,48], index: 2, kind: input, shape index: {}]   ;;  %s526_s0 = inlined_call_operand.vmem [shape: f32[128,128], index: 0, kind: input, shape index: {}]   ;;  %s527_s3 = inlined_call_operand.vmem [shape: f32[128,48], index: 3, kind: output, shape index: {}]  }
   0x1   :  { %v82_v0 = vld [vmem:[%s524_s1 + $0x78] sm:$0xff]  ;;  %v81_v1 = vld [vmem:[%s524_s1 + $0x70] sm:$0xff]  ;;  %v80_v2 = vld [vmem:[%s524_s1 + $0x68] sm:$0xff]  ;;  %19 = vst.msk [vmem:[#allocation2] sm:$0xff] %vm18_vm0, %v290_v15 }
   0x2   :  { %241 = vmatpush.msra.mxu2 %v82_v0  ;;  %242 = vmatpush.msra.mxu3 %v82_v0  ;;  %v79_v3 = vld [vmem:[%s524_s1 + $0x60] sm:$0xff]  ;;  %v78_v4 = vld [vmem:[%s524_s1 + $0x58] sm:$0xff]  ;;  %v77_v5 = vld [vmem:[%s524_s1 + $0x50] sm:$0xff]  ;;  %20 = vst.msk [vmem:[#allocation2 + $0x8] sm:$0xff] %vm18_vm0, %v290_v15 }
   0x3   :  { %83 = vmatpush.msra.mxu0 %v82_v0  ;;  %240 = vmatpush.msra.mxu1 %v82_v0  ;;  %v76_v6 = vld [vmem:[%s524_s1 + $0x48] sm:$0xff]  ;;  %v75_v7 = vld [vmem:[%s524_s1 + $0x40] sm:$0xff]  ;;  %v74_v8 = vld [vmem:[%s524_s1 + $0x38] sm:$0xff]  ;;  %21 = vst.msk [vmem:[#allocation2 + $0x10] sm:$0xff] %vm18_vm0, %v290_v15 }
   0x4   :  { %244 = vmatpush.msra.mxu2 %v81_v1  ;;  %245 = vmatpush.msra.mxu3 %v81_v1  ;;  %v73_v9 = vld [vmem:[%s524_s1 + $0x30] sm:$0xff]  ;;  %v72_v10 = vld [vmem:[%s524_s1 + $0x28] sm:$0xff]  ;;  %v71_v11 = vld [vmem:[%s524_s1 + $0x20] sm:$0xff]  ;;  %22 = vst.msk [vmem:[#allocation2 + $0x18] sm:$0xff] %vm18_vm0, %v290_v15 }
   0x5   :  { %84 = vmatpush.msra.mxu0 %v81_v1  ;;  %243 = vmatpush.msra.mxu1 %v81_v1  ;;  %v70_v12 = vld [vmem:[%s524_s1 + $0x18] sm:$0xff]  ;;  %v69_v13 = vld [vmem:[%s524_s1 + $0x10] sm:$0xff]  ;;  %v68_v14 = vld [vmem:[%s524_s1 + $0x8] sm:$0xff]  ;;  %23 = vst.msk [vmem:[#allocation2 + $0x20] sm:$0xff] %vm18_vm0, %v290_v15 }
   0x6   :  { %247 = vmatpush.msra.mxu2 %v80_v2  ;;  %248 = vmatpush.msra.mxu3 %v80_v2  ;;  %v67_v16 = vld [vmem:[%s524_s1] sm:$0xff]  ;;  %24 = vst.msk [vmem:[#allocation2 + $0x28] sm:$0xff] %vm18_vm0, %v290_v15  ;;  %v60_v21 = vld [vmem:[%s526_s0 + $0x48] sm:$0xff]  ;;  %v61_v25 = vld [vmem:[%s526_s0 + $0x50] sm:$0xff] }
   0x7   :  { %85 = vmatpush.msra.mxu0 %v80_v2  ;;  %246 = vmatpush.msra.mxu1 %v80_v2  ;;  %v59_v17 = vld [vmem:[%s526_s0 + $0x40] sm:$0xff]  ;;  %25 = vst.msk [vmem:[#allocation2 + $0x30] sm:$0xff] %vm18_vm0, %v290_v15  ;;  %v64_v22 = vld [vmem:[%s526_s0 + $0x68] sm:$0xff]  ;;  %v65_v26 = vld [vmem:[%s526_s0 + $0x70] sm:$0xff] }
   0x8   :  { %250 = vmatpush.msra.mxu2 %v79_v3  ;;  %251 = vmatpush.msra.mxu3 %v79_v3  ;;  %v63_v18 = vld [vmem:[%s526_s0 + $0x60] sm:$0xff]  ;;  %26 = vst.msk [vmem:[#allocation2 + $0x38] sm:$0xff] %vm18_vm0, %v290_v15  ;;  %v52_v23 = vld [vmem:[%s526_s0 + $0x8] sm:$0xff]  ;;  %v53_v27 = vld [vmem:[%s526_s0 + $0x10] sm:$0xff] }
   0x9   :  { %86 = vmatpush.msra.mxu0 %v79_v3  ;;  %249 = vmatpush.msra.mxu1 %v79_v3  ;;  %v51_v19 = vld [vmem:[%s526_s0] sm:$0xff]  ;;  %27 = vst.msk [vmem:[#allocation2 + $0x40] sm:$0xff] %vm18_vm0, %v290_v15  ;;  %v56_v24 = vld [vmem:[%s526_s0 + $0x28] sm:$0xff]  ;;  %v57_v28 = vld [vmem:[%s526_s0 + $0x30] sm:$0xff] }
   0xa   :  { %253 = vmatpush.msra.mxu2 %v78_v4  ;;  %254 = vmatpush.msra.mxu3 %v78_v4  ;;  %v55_v20 = vld [vmem:[%s526_s0 + $0x20] sm:$0xff]  ;;  %28 = vst.msk [vmem:[#allocation2 + $0x48] sm:$0xff] %vm18_vm0, %v290_v15  ;;  %v62_v29 = vld [vmem:[%s526_s0 + $0x58] sm:$0xff]  ;;  %v36_v45 = vld [vmem:[#allocation2 + $0x8] sm:$0xff] }
   0xb   :  { %87 = vmatpush.msra.mxu0 %v78_v4  ;;  %252 = vmatpush.msra.mxu1 %v78_v4  ;;  %29 = vst.msk [vmem:[#allocation2 + $0x50] sm:$0xff] %vm18_vm0, %v290_v15  ;;  %v66_v30 = vld [vmem:[%s526_s0 + $0x78] sm:$0xff]  ;;  %v35_v33 = vld [vmem:[#allocation2] sm:$0xff]  ;;  %v37_v63 = vld [vmem:[#allocation2 + $0x10] sm:$0xff] }
   0xc   :  { %256 = vmatpush.msra.mxu2 %v77_v5  ;;  %257 = vmatpush.msra.mxu3 %v77_v5  ;;  %30 = vst.msk [vmem:[#allocation2 + $0x58] sm:$0xff] %vm18_vm0, %v290_v15  ;;  %v54_v31 = vld [vmem:[%s526_s0 + $0x18] sm:$0xff]  ;;  %v39_v34 = vld [vmem:[#allocation2 + $0x20] sm:$0xff] }
   0xd   :  { %88 = vmatpush.msra.mxu0 %v77_v5  ;;  %255 = vmatpush.msra.mxu1 %v77_v5  ;;  %31 = vst.msk [vmem:[#allocation2 + $0x60] sm:$0xff] %vm18_vm0, %v290_v15  ;;  %v58_v32 = vld [vmem:[%s526_s0 + $0x38] sm:$0xff]  ;;  %v40_v46 = vld [vmem:[#allocation2 + $0x28] sm:$0xff]  ;;  %v428_v47 = vld [vmem:[%s525_s2] ss:$0 sm:$0xff] }
   0xe   :  { %259 = vmatpush.msra.mxu2 %v76_v6  ;;  %260 = vmatpush.msra.mxu3 %v76_v6  ;;  %32 = vst.msk [vmem:[#allocation2 + $0x68] sm:$0xff] %vm18_vm0, %v290_v15  ;;  %v41_v0 = vld [vmem:[#allocation2 + $0x30] sm:$0xff] }
   0xf   :  { %89 = vmatpush.msra.mxu0 %v76_v6  ;;  %258 = vmatpush.msra.mxu1 %v76_v6  ;;  %33 = vst.msk [vmem:[#allocation2 + $0x70] sm:$0xff] %vm18_vm0, %v290_v15 }
  0x10   :  { %262 = vmatpush.msra.mxu2 %v75_v7  ;;  %263 = vmatpush.msra.mxu3 %v75_v7  ;;  %34 = vst.msk [vmem:[#allocation2 + $0x78] sm:$0xff] %vm18_vm0, %v290_v15  ;;  %v43_v39 = vld [vmem:[#allocation2 + $0x40] sm:$0xff] }
  0x11   :  { %90 = vmatpush.msra.mxu0 %v75_v7  ;;  %261 = vmatpush.msra.mxu1 %v75_v7  ;;  %v44_v53 = vld [vmem:[#allocation2 + $0x48] sm:$0xff] }
  0x12   :  { %265 = vmatpush.msra.mxu2 %v74_v8  ;;  %266 = vmatpush.msra.mxu3 %v74_v8 }
  0x13   :  { %91 = vmatpush.msra.mxu0 %v74_v8  ;;  %264 = vmatpush.msra.mxu1 %v74_v8 }
  0x14   :  { %268 = vmatpush.msra.mxu2 %v73_v9  ;;  %269 = vmatpush.msra.mxu3 %v73_v9  ;;  %v47_v40 = vld [vmem:[#allocation2 + $0x60] sm:$0xff] }
  0x15   :  { %92 = vmatpush.msra.mxu0 %v73_v9  ;;  %267 = vmatpush.msra.mxu1 %v73_v9  ;;  %v48_v54 = vld [vmem:[#allocation2 + $0x68] sm:$0xff]  ;;  %v45_v9 = vld [vmem:[#allocation2 + $0x50] sm:$0xff] }
  0x16   :  { %271 = vmatpush.msra.mxu2 %v72_v10  ;;  %272 = vmatpush.msra.mxu3 %v72_v10 }
  0x17   :  { %93 = vmatpush.msra.mxu0 %v72_v10  ;;  %270 = vmatpush.msra.mxu1 %v72_v10  ;;  %v49_v10 = vld [vmem:[#allocation2 + $0x70] sm:$0xff] }
  0x18   :  { %274 = vmatpush.msra.mxu2 %v71_v11  ;;  %275 = vmatpush.msra.mxu3 %v71_v11 }
  0x19   :  { %94 = vmatpush.msra.mxu0 %v71_v11  ;;  %273 = vmatpush.msra.mxu1 %v71_v11 }
  0x1a   :  { %277 = vmatpush.msra.mxu2 %v70_v12  ;;  %278 = vmatpush.msra.mxu3 %v70_v12 }
  0x1b   :  { %95 = vmatpush.msra.mxu0 %v70_v12  ;;  %276 = vmatpush.msra.mxu1 %v70_v12 }
  0x1c   :  { %280 = vmatpush.msra.mxu2 %v69_v13  ;;  %281 = vmatpush.msra.mxu3 %v69_v13 }
  0x1d   :  { %96 = vmatpush.msra.mxu0 %v69_v13  ;;  %279 = vmatpush.msra.mxu1 %v69_v13 }
  0x1e   :  { %283 = vmatpush.msra.mxu2 %v68_v14  ;;  %284 = vmatpush.msra.mxu3 %v68_v14 }
  0x1f   :  { %97 = vmatpush.msra.mxu0 %v68_v14  ;;  %282 = vmatpush.msra.mxu1 %v68_v14 }
  0x20   :  { %286 = vmatpush.msra.mxu2 %v67_v16  ;;  %287 = vmatpush.msra.mxu3 %v67_v16 }
  0x21   :  { %123 = vmatmul.f32.vlgmr.msra.gmra.mxu2 %v59_v17  ;;  %135 = vmatmul.f32.vlgmr.msra.gmra.mxu3 %v63_v18 }
  0x22   :  { %98 = vmatpush.msra.mxu0 %v67_v16  ;;  %285 = vmatpush.msra.mxu1 %v67_v16 }
  0x23   :  { %99 = vmatmul.f32.vlgmr.msra.gmra.mxu0 %v51_v19  ;;  %111 = vmatmul.f32.vlgmr.msra.gmra.mxu1 %v55_v20  ;;  %v38_v19 = vld [vmem:[#allocation2 + $0x18] sm:$0xff] }
  0x24   :  { %v42_v20 = vld [vmem:[#allocation2 + $0x38] sm:$0xff] }
  0x29   :  { %126 = vmatmul.f32.gmra.mxu2 %v60_v21  ;;  %138 = vmatmul.f32.gmra.mxu3 %v64_v22 }
  0x2b   :  { %102 = vmatmul.f32.gmra.mxu0 %v52_v23  ;;  %114 = vmatmul.f32.gmra.mxu1 %v56_v24 }
  0x31   :  { %129 = vmatmul.f32.gmra.mxu2 %v61_v25  ;;  %141 = vmatmul.f32.gmra.mxu3 %v65_v26 }
  0x33   :  { %105 = vmatmul.f32.gmra.mxu0 %v53_v27  ;;  %117 = vmatmul.f32.gmra.mxu1 %v57_v28 }
  0x39   :  { %132 = vmatmul.f32.gmra.mxu2 %v62_v29  ;;  %144 = vmatmul.f32.gmra.mxu3 %v66_v30  ;;  %v46_v29 = vld [vmem:[#allocation2 + $0x58] sm:$0xff] }
  0x3a   :  { %v50_v30 = vld [vmem:[#allocation2 + $0x78] sm:$0xff] }
  0x3b   :  { %108 = vmatmul.f32.gmra.mxu0 %v54_v31  ;;  %120 = vmatmul.f32.gmra.mxu1 %v58_v32 }
  0xa0   :  { %v100_v35 = vpop.f32.mrf.mxu0  ;;  %v112_v36 = vpop.f32.mrf.mxu1 }
  0xa1   :  { %v148_v37 = vadd.f32 %v100_v35, %v35_v33  ;;  %v152_v38 = vadd.f32 %v112_v36, %v39_v34 }
  0xa3   :  { %165 = vst.msk [vmem:[#allocation2] sm:$0xff] %vm18_vm0, %v148_v37 }
  0xa4   :  { %169 = vst.msk [vmem:[#allocation2 + $0x20] sm:$0xff] %vm18_vm0, %v152_v38  ;;  %v124_v41 = vpop.f32.mrf.mxu2  ;;  %v136_v42 = vpop.f32.mrf.mxu3 }
  0xa5   :  { %v156_v43 = vadd.f32 %v124_v41, %v43_v39  ;;  %v160_v44 = vadd.f32 %v136_v42, %v47_v40 }
  0xa7   :  { %173 = vst.msk [vmem:[#allocation2 + $0x40] sm:$0xff] %vm18_vm0, %v156_v43 }
  0xa8   :  { %177 = vst.msk [vmem:[#allocation2 + $0x60] sm:$0xff] %vm18_vm0, %v160_v44  ;;  %v103_v48 = vpop.f32.mrf.mxu0  ;;  %v115_v49 = vpop.f32.mrf.mxu1 }
  0xa9   :  { %v149_v50 = vadd.f32 %v103_v48, %v36_v45  ;;  %v153_v51 = vadd.f32 %v115_v49, %v40_v46 }
  0xaa   :  { %v184_v52 = vld [vmem:[#allocation2] sm:$0xff] }
  0xab   :  { %v204_v55 = vadd.f32 %v428_v47, %v184_v52  ;;  %v188_v56 = vld [vmem:[#allocation2 + $0x20] sm:$0xff]  ;;  %166 = vst.msk [vmem:[#allocation2 + $0x8] sm:$0xff] %vm18_vm0, %v149_v50 }
  0xac   :  { %v208_v57 = vadd.f32 %v428_v47, %v188_v56  ;;  %170 = vst.msk [vmem:[#allocation2 + $0x28] sm:$0xff] %vm18_vm0, %v153_v51  ;;  %v127_v58 = vpop.f32.mrf.mxu2  ;;  %v139_v59 = vpop.f32.mrf.mxu3 }
  0xad   :  { %220 = vst.msk [vmem:[%s527_s3] sm:$0xff] %vm18_vm0, %v204_v55  ;;  %v157_v60 = vadd.f32 %v127_v58, %v44_v53  ;;  %v161_v61 = vadd.f32 %v139_v59, %v48_v54 }
  0xae   :  { %224 = vst.msk [vmem:[%s527_s3 + $0x20] sm:$0xff] %vm18_vm0, %v208_v57  ;;  %v192_v62 = vld [vmem:[#allocation2 + $0x40] sm:$0xff] }
  0xaf   :  { %v212_v1 = vadd.f32 %v428_v47, %v192_v62  ;;  %v196_v2 = vld [vmem:[#allocation2 + $0x60] sm:$0xff]  ;;  %174 = vst.msk [vmem:[#allocation2 + $0x48] sm:$0xff] %vm18_vm0, %v157_v60 }
  0xb0   :  { %v216_v3 = vadd.f32 %v428_v47, %v196_v2  ;;  %178 = vst.msk [vmem:[#allocation2 + $0x68] sm:$0xff] %vm18_vm0, %v161_v61  ;;  %v106_v4 = vpop.f32.mrf.mxu0  ;;  %v118_v5 = vpop.f32.mrf.mxu1 }
  0xb1   :  { %228 = vst.msk [vmem:[%s527_s3 + $0x40] sm:$0xff] %vm18_vm0, %v212_v1  ;;  %v150_v6 = vadd.f32 %v106_v4, %v37_v63  ;;  %v154_v7 = vadd.f32 %v118_v5, %v41_v0 }
  0xb2   :  { %232 = vst.msk [vmem:[%s527_s3 + $0x60] sm:$0xff] %vm18_vm0, %v216_v3  ;;  %v185_v8 = vld [vmem:[#allocation2 + $0x8] sm:$0xff] }
  0xb3   :  { %v205_v11 = vadd.f32 %v428_v47, %v185_v8  ;;  %v189_v12 = vld [vmem:[#allocation2 + $0x28] sm:$0xff]  ;;  %167 = vst.msk [vmem:[#allocation2 + $0x10] sm:$0xff] %vm18_vm0, %v150_v6 }
  0xb4   :  { %v209_v13 = vadd.f32 %v428_v47, %v189_v12  ;;  %171 = vst.msk [vmem:[#allocation2 + $0x30] sm:$0xff] %vm18_vm0, %v154_v7  ;;  %v130_v14 = vpop.f32.mrf.mxu2  ;;  %v142_v15 = vpop.f32.mrf.mxu3 }
  0xb5   :  { %221 = vst.msk [vmem:[%s527_s3 + $0x8] sm:$0xff] %vm18_vm0, %v205_v11  ;;  %v158_v16 = vadd.f32 %v130_v14, %v45_v9  ;;  %v162_v17 = vadd.f32 %v142_v15, %v49_v10 }
  0xb6   :  { %225 = vst.msk [vmem:[%s527_s3 + $0x28] sm:$0xff] %vm18_vm0, %v209_v13  ;;  %v193_v18 = vld [vmem:[#allocation2 + $0x48] sm:$0xff] }
  0xb7   :  { %v213_v21 = vadd.f32 %v428_v47, %v193_v18  ;;  %v197_v22 = vld [vmem:[#allocation2 + $0x68] sm:$0xff]  ;;  %175 = vst.msk [vmem:[#allocation2 + $0x50] sm:$0xff] %vm18_vm0, %v158_v16 }
  0xb8   :  { %v217_v23 = vadd.f32 %v428_v47, %v197_v22  ;;  %179 = vst.msk [vmem:[#allocation2 + $0x70] sm:$0xff] %vm18_vm0, %v162_v17  ;;  %v109_v24 = vpop.f32.mrf.mxu0  ;;  %v121_v25 = vpop.f32.mrf.mxu1 }
  0xb9   :  { %229 = vst.msk [vmem:[%s527_s3 + $0x48] sm:$0xff] %vm18_vm0, %v213_v21  ;;  %v151_v26 = vadd.f32 %v109_v24, %v38_v19  ;;  %v155_v27 = vadd.f32 %v121_v25, %v42_v20 }
  0xba   :  { %233 = vst.msk [vmem:[%s527_s3 + $0x68] sm:$0xff] %vm18_vm0, %v217_v23  ;;  %v186_v28 = vld [vmem:[#allocation2 + $0x10] sm:$0xff] }
  0xbb   :  { %v206_v31 = vadd.f32 %v428_v47, %v186_v28  ;;  %v190_v32 = vld [vmem:[#allocation2 + $0x30] sm:$0xff]  ;;  %168 = vst.msk [vmem:[#allocation2 + $0x18] sm:$0xff] %vm18_vm0, %v151_v26 }
  0xbc   :  { %v210_v33 = vadd.f32 %v428_v47, %v190_v32  ;;  %172 = vst.msk [vmem:[#allocation2 + $0x38] sm:$0xff] %vm18_vm0, %v155_v27  ;;  %v133_v34 = vpop.f32.mrf.mxu2  ;;  %v145_v35 = vpop.f32.mrf.mxu3 }
  0xbd   :  { %222 = vst.msk [vmem:[%s527_s3 + $0x10] sm:$0xff] %vm18_vm0, %v206_v31  ;;  %v159_v36 = vadd.f32 %v133_v34, %v46_v29  ;;  %v163_v37 = vadd.f32 %v145_v35, %v50_v30 }
  0xbe   :  { %226 = vst.msk [vmem:[%s527_s3 + $0x30] sm:$0xff] %vm18_vm0, %v210_v33  ;;  %v194_v38 = vld [vmem:[#allocation2 + $0x50] sm:$0xff] }
  0xbf   :  { %v214_v39 = vadd.f32 %v428_v47, %v194_v38  ;;  %v198_v40 = vld [vmem:[#allocation2 + $0x70] sm:$0xff]  ;;  %176 = vst.msk [vmem:[#allocation2 + $0x58] sm:$0xff] %vm18_vm0, %v159_v36 }
  0xc0   :  { %v218_v41 = vadd.f32 %v428_v47, %v198_v40  ;;  %180 = vst.msk [vmem:[#allocation2 + $0x78] sm:$0xff] %vm18_vm0, %v163_v37 }
  0xc1   :  { %230 = vst.msk [vmem:[%s527_s3 + $0x50] sm:$0xff] %vm18_vm0, %v214_v39 }
  0xc2   :  { %234 = vst.msk [vmem:[%s527_s3 + $0x70] sm:$0xff] %vm18_vm0, %v218_v41  ;;  %v187_v42 = vld [vmem:[#allocation2 + $0x18] sm:$0xff] }
  0xc3   :  { %v207_v43 = vadd.f32 %v428_v47, %v187_v42  ;;  %v191_v44 = vld [vmem:[#allocation2 + $0x38] sm:$0xff] }
  0xc4   :  { %v211_v45 = vadd.f32 %v428_v47, %v191_v44 }
  0xc5   :  { %223 = vst.msk [vmem:[%s527_s3 + $0x18] sm:$0xff] %vm18_vm0, %v207_v43 }
  0xc6   :  { %227 = vst.msk [vmem:[%s527_s3 + $0x38] sm:$0xff] %vm18_vm0, %v211_v45  ;;  %v195_v46 = vld [vmem:[#allocation2 + $0x58] sm:$0xff] }
  0xc7   :  { %v215_v48 = vadd.f32 %v428_v47, %v195_v46  ;;  %v199_v49 = vld [vmem:[#allocation2 + $0x78] sm:$0xff] }
  0xc8   :  { %v219_v50 = vadd.f32 %v428_v47, %v199_v49 }
  0xc9   :  { %231 = vst.msk [vmem:[%s527_s3 + $0x58] sm:$0xff] %vm18_vm0, %v215_v48 }
  0xca   :  { %235 = vst.msk [vmem:[%s527_s3 + $0x78] sm:$0xff] %vm18_vm0, %v219_v50 }

</bundles_post_ra>
